<compile_context>
chip_gen: v5e
topology: v5e:2x2
jax: 0.10.0
libtpu: 0.0.40
codegen_flags: <defaults>
</compile_context>

<pallas_src>
import functools

import jax
import jax.numpy as jnp
from jax.experimental import pallas as pl
from jax.experimental.pallas import tpu as pltpu


# ---------------------------------------------------------------------------
# Fused kernel: kt tap matmuls (Align residual pre-folded into tap kt-1)
#               + bias + GLU / sigmoid / ReLU epilogue.  One batch tile/step.
# ---------------------------------------------------------------------------
def _tconv_kernel(x_ref, w_ref, b_ref, o_ref, *, kt, rows_per_t, lout, c_out,
                  act, precision):
    """
    x_ref : (1, L*rows_per_t, c_in)     time-major rows, row = t*rpt + b*Vp + v
    w_ref : (kt, c_in, c_tot)           tap kt-1 already contains the Align fold
    b_ref : (1, c_tot)                  conv bias (+ folded align bias)
    o_ref : (1, lout*rows_per_t, c_out)
    """
    x = x_ref[0]                                    # VMEM-resident block
    acc = None
    for k in range(kt):                             # kt is tiny -> unrolled
        xk = x[k * rows_per_t:(k + lout) * rows_per_t, :]   # sublane-aligned
        d = jnp.dot(xk, w_ref[k], preferred_element_type=jnp.float32,
                    precision=precision)
        acc = d if acc is None else acc + d
    y = acc + b_ref[...]                            # f32 (lout*rpt, c_tot)

    if act == "GLU":
        # value half already holds conv + residual (align folded into weights)
        out = y[:, :c_out] * jax.nn.sigmoid(y[:, c_out:])
    elif act == "sigmoid":
        out = jax.nn.sigmoid(y)
    else:                                           # 'relu' (default)
        out = jnp.maximum(y, 0.0)

    o_ref[0] = out


def temporal_conv_layer(x, params, *, kt, c_in, c_out, act="relu",
                        mxu_bf16=False, batch_tile=None, precision=None):
    """TemporalConvLayer forward.  x: (N, c_in, L, V) -> (N, c_out, L-kt+1, V).

    params:
      "w"       : (c_out_total, c_in, kt, 1)   nn.Conv2d((kt,1)) weight
      "b"       : (c_out_total,)
      "align_w" : (c_out, c_in, 1, 1)          only when c_in > c_out
      "align_b" : (c_out,)                     only when c_in > c_out
    where c_out_total = 2*c_out for act == 'GLU', else c_out.
    """
    B, cx, L, V = x.shape
    assert cx == c_in
    lout = L - kt + 1
    c_tot = 2 * c_out if act == "GLU" else c_out

    # ---- fold the Align residual into the conv weights (value half) -------
    w = params["w"].reshape(c_tot, c_in, kt)
    wk = jnp.transpose(w, (2, 1, 0)).astype(jnp.float32)   # (kt, c_in, c_tot)
    b = params["b"].reshape(1, c_tot).astype(jnp.float32)
    if c_in > c_out:                      # Align = 1x1 conv
        a_w = jnp.transpose(params["align_w"].reshape(c_out, c_in))
        a_b = params["align_b"].reshape(1, c_out).astype(jnp.float32)
    else:                                 # identity (c_in==c_out) / zero pad
        a_w = jnp.eye(c_in, c_out, dtype=jnp.float32)
        a_b = jnp.zeros((1, c_out), jnp.float32)
    wk = wk.at[kt - 1, :, :c_out].add(a_w)   # x_in is exactly the tap-(kt-1) slice
    b = b.at[:, :c_out].add(a_b)

    w_dt = jnp.bfloat16 if mxu_bf16 else jnp.float32
    wk = wk.astype(w_dt)                     # cast hoisted out of the kernel

    # ---- rows layout: time-major, batch folded into the matmul M ----------
    Vp = -(-V // 8) * 8                      # sublane-aligned tap slices
    x_bytes = 2 if mxu_bf16 else 4

    def _vmem_est(bt):
        rows_in, rows_out = L * bt * Vp, lout * bt * Vp
        return (2 * rows_in * c_in * x_bytes          # double-buffered input
                + 2 * rows_out * c_out * 4            # double-buffered output
                + kt * c_in * c_tot * x_bytes + 4 * c_tot
                + rows_out * (c_tot + c_out) * 4)     # in-kernel f32 slabs

    if batch_tile is None:
        want_steps = 2 if B >= 2 else 1               # feed both v7x TCs
        batch_tile = 1
        for bt in range(B, 0, -1):
            if B % bt == 0 and B // bt >= want_steps and _vmem_est(bt) <= (24 << 20):
                batch_tile = bt
                break
    assert B % batch_tile == 0, (B, batch_tile)
    nb = B // batch_tile
    rows_per_t = batch_tile * Vp

    xp = x if Vp == V else jnp.pad(x, ((0, 0), (0, 0), (0, 0), (0, Vp - V)))
    # (B,C,L,Vp) -> (nb, L, Bt, Vp, C) -> (nb, L*Bt*Vp, C); fuses with the cast.
    xr = jnp.transpose(xp.reshape(nb, batch_tile, c_in, L, Vp),
                       (0, 3, 1, 4, 2)).reshape(nb, L * rows_per_t, c_in)
    xr = xr.astype(w_dt)                     # bf16 stream halves HBM bytes

    def _rep(shape):                         # replicated (weights/bias) spec
        nd = len(shape)
        return pl.BlockSpec(shape, lambda n, _nd=nd: (0,) * _nd)

    out = pl.pallas_call(
        functools.partial(_tconv_kernel, kt=kt, rows_per_t=rows_per_t,
                          lout=lout, c_out=c_out, act=act, precision=precision),
        grid=(nb,),
        in_specs=[pl.BlockSpec((1, L * rows_per_t, c_in), lambda n: (n, 0, 0)),
                  _rep(wk.shape), _rep(b.shape)],
        out_specs=pl.BlockSpec((1, lout * rows_per_t, c_out),
                               lambda n: (n, 0, 0)),
        out_shape=jax.ShapeDtypeStruct((nb, lout * rows_per_t, c_out),
                                       jnp.float32),
        compiler_params=pltpu.CompilerParams(
            dimension_semantics=("parallel",),        # 2-way TC shard on v7x
            vmem_limit_bytes=32 * 1024 * 1024),       # v7x-safe explicit limit
    )(xr, wk, b)

    # single relayout back to the PyTorch NCHW convention at the boundary
    o = out.reshape(nb, lout, batch_tile, Vp, c_out)[:, :, :, :V, :]
    return jnp.transpose(o, (0, 2, 4, 1, 3)).reshape(B, c_out, lout, V)


# ---------------------------------------------------------------------------
# Pure-JAX reference (mirrors the PyTorch forward) for correctness checking
# ---------------------------------------------------------------------------
def temporal_conv_ref(x, params, *, kt, c_in, c_out, act="relu"):
    hp = jax.lax.Precision.HIGHEST
    lout = x.shape[2] - kt + 1
    if c_in > c_out:
        aw = params["align_w"].reshape(c_out, c_in)
        x_al = (jnp.einsum("oi,nilv->nolv", aw, x, precision=hp)
                + params["align_b"][None, :, None, None])
    elif c_in < c_out:
        x_al = jnp.pad(x, ((0, 0), (0, c_out - c_in), (0, 0), (0, 0)))
    else:
        x_al = x
    x_in = x_al[:, :, kt - 1:, :]
    c_tot = 2 * c_out if act == "GLU" else c_out
    w = params["w"].reshape(c_tot, c_in, kt)
    y = sum(jnp.einsum("oi,nilv->nolv", w[:, :, k], x[:, :, k:k + lout, :],
                       precision=hp) for k in range(kt))
    y = y + params["b"][None, :, None, None]
    if act == "GLU":
        return (y[:, :c_out] + x_in) * jax.nn.sigmoid(y[:, c_out:])
    if act == "sigmoid":
        return jax.nn.sigmoid(y + x_in)
    return jnp.maximum(y + x_in, 0.0)


# ---------------------------------------------------------------------------
if __name__ == "__main__":
    B, L, kt = 4, 8, 3
    # (act, c_in, c_out, bf16 MXU operands, V) — exercises every Align fold,
    # the fused GLU matmul, the bf16 fast path and non-multiple-of-8 V padding.
    configs = [
        ("GLU",      3, 32, False,  8),   # c_in <  c_out : zero-pad align fold
        ("relu",    64, 32, False,  8),   # c_in >  c_out : 1x1-conv align fold
        ("sigmoid", 32, 32, False,  8),   # c_in == c_out : identity fold
        ("GLU",     64, 32, True,   8),   # bf16 operands, f32 accumulate
        ("relu",    16, 32, False, 12),   # V=12 -> padded to 16 internally
    ]

    key = jax.random.PRNGKey(0)
    for act, c_in, c_out, use_bf16, V in configs:
        key, kx, kw, kb, kaw, kab = jax.random.split(key, 6)
        c_tot = 2 * c_out if act == "GLU" else c_out
        x = jax.random.normal(kx, (B, c_in, L, V), dtype=jnp.float32)
        params = {
            "w": 0.1 * jax.random.normal(kw, (c_tot, c_in, kt, 1), jnp.float32),
            "b": 0.1 * jax.random.normal(kb, (c_tot,), jnp.float32),
        }
        if c_in > c_out:
            params["align_w"] = 0.1 * jax.random.normal(
                kaw, (c_out, c_in, 1, 1), jnp.float32)
            params["align_b"] = 0.1 * jax.random.normal(
                kab, (c_out,), jnp.float32)

        fwd = jax.jit(functools.partial(
            temporal_conv_layer, kt=kt, c_in=c_in, c_out=c_out, act=act,
            mxu_bf16=use_bf16))
        y = jax.block_until_ready(fwd(x, params))
        assert y.shape == (B, c_out, L - kt + 1, V), y.shape

        y_ref = temporal_conv_ref(x, params, kt=kt, c_in=c_in, c_out=c_out,
                                  act=act)
        err = float(jnp.max(jnp.abs(y - y_ref)))
        tol = 8e-2 if use_bf16 else 3e-2
        assert err < tol, (act, c_in, c_out, use_bf16, V, err)

    print("KERNEL_OK")
</pallas_src>

<mosaic_0001>
module attributes {stable_mosaic.version = 11 : i64} {
  func.func @_tconv_kernel(%arg0: i32, %arg1: memref<1x128x3xf32, #tpu.memory_space<vmem>>, %arg2: memref<3x3x64xf32, #tpu.memory_space<vmem>>, %arg3: memref<1x64xf32, #tpu.memory_space<vmem>>, %arg4: memref<1x96x32xf32, #tpu.memory_space<vmem>>) attributes {dimension_semantics = [#tpu.dimension_semantics<parallel>], iteration_bounds = array<i64: 2>, scalar_prefetch = 0 : i64, scratch_operands = 0 : i64, tpu.core_type = #tpu.core_type<tc>, window_params = [{transform_indices = @transform_0, window_bounds = array<i64: 1, 128, 3>}, {pipeline_mode = #tpu.pipeline_mode<synchronous>, transform_indices = @transform_1, window_bounds = array<i64: 3, 3, 64>}, {pipeline_mode = #tpu.pipeline_mode<synchronous>, transform_indices = @transform_2, window_bounds = array<i64: 1, 64>}, {transform_indices = @transform_3, window_bounds = array<i64: 1, 96, 32>}]} {
    %c0 = arith.constant 0 : index
    %c0_0 = arith.constant 0 : index
    %c0_1 = arith.constant 0 : index
    %0 = vector.load %arg1[%c0, %c0_0, %c0_1] : memref<1x128x3xf32, #tpu.memory_space<vmem>>, vector<1x128x3xf32>
    %1 = vector.shape_cast %0 : vector<1x128x3xf32> to vector<128x3xf32>
    %2 = vector.extract_strided_slice %1 {offsets = [0, 0], sizes = [96, 3], strides = [1, 1]} : vector<128x3xf32> to vector<96x3xf32>
    %c0_2 = arith.constant 0 : index
    %c0_3 = arith.constant 0 : index
    %c0_4 = arith.constant 0 : index
    %3 = vector.load %arg2[%c0_2, %c0_3, %c0_4] : memref<3x3x64xf32, #tpu.memory_space<vmem>>, vector<1x3x64xf32>
    %4 = vector.shape_cast %3 : vector<1x3x64xf32> to vector<3x64xf32>
    %cst = arith.constant dense<0.000000e+00> : vector<96x64xf32>
    %5 = tpu.matmul %2, %4, %cst {dimension_numbers = #tpu.dot_dimension_numbers<[1], [0], [0], [1], [0, 0, 1, 1], [], []>} : vector<96x3xf32>, vector<3x64xf32>, vector<96x64xf32> -> vector<96x64xf32>
    %6 = vector.extract_strided_slice %1 {offsets = [16, 0], sizes = [96, 3], strides = [1, 1]} : vector<128x3xf32> to vector<96x3xf32>
    %c1 = arith.constant 1 : index
    %c0_5 = arith.constant 0 : index
    %c0_6 = arith.constant 0 : index
    %7 = vector.load %arg2[%c1, %c0_5, %c0_6] : memref<3x3x64xf32, #tpu.memory_space<vmem>>, vector<1x3x64xf32>
    %8 = vector.shape_cast %7 : vector<1x3x64xf32> to vector<3x64xf32>
    %cst_7 = arith.constant dense<0.000000e+00> : vector<96x64xf32>
    %9 = tpu.matmul %6, %8, %cst_7 {dimension_numbers = #tpu.dot_dimension_numbers<[1], [0], [0], [1], [0, 0, 1, 1], [], []>} : vector<96x3xf32>, vector<3x64xf32>, vector<96x64xf32> -> vector<96x64xf32>
    %10 = arith.addf %5, %9 : vector<96x64xf32>
    %11 = vector.extract_strided_slice %1 {offsets = [32, 0], sizes = [96, 3], strides = [1, 1]} : vector<128x3xf32> to vector<96x3xf32>
    %c2 = arith.constant 2 : index
    %c0_8 = arith.constant 0 : index
    %c0_9 = arith.constant 0 : index
    %12 = vector.load %arg2[%c2, %c0_8, %c0_9] : memref<3x3x64xf32, #tpu.memory_space<vmem>>, vector<1x3x64xf32>
    %13 = vector.shape_cast %12 : vector<1x3x64xf32> to vector<3x64xf32>
    %cst_10 = arith.constant dense<0.000000e+00> : vector<96x64xf32>
    %14 = tpu.matmul %11, %13, %cst_10 {dimension_numbers = #tpu.dot_dimension_numbers<[1], [0], [0], [1], [0, 0, 1, 1], [], []>} : vector<96x3xf32>, vector<3x64xf32>, vector<96x64xf32> -> vector<96x64xf32>
    %15 = arith.addf %10, %14 : vector<96x64xf32>
    %c0_11 = arith.constant 0 : index
    %c0_12 = arith.constant 0 : index
    %16 = vector.load %arg3[%c0_11, %c0_12] : memref<1x64xf32, #tpu.memory_space<vmem>>, vector<1x64xf32>
    %17 = vector.broadcast %16 : vector<1x64xf32> to vector<96x64xf32>
    %18 = arith.addf %15, %17 : vector<96x64xf32>
    %19 = vector.extract_strided_slice %18 {offsets = [0, 0], sizes = [96, 32], strides = [1, 1]} : vector<96x64xf32> to vector<96x32xf32>
    %20 = vector.extract_strided_slice %18 {offsets = [0, 32], sizes = [96, 32], strides = [1, 1]} : vector<96x64xf32> to vector<96x32xf32>
    %21 = arith.negf %20 : vector<96x32xf32>
    %22 = math.exp %21 : vector<96x32xf32>
    %cst_13 = arith.constant 1.000000e+00 : f32
    %23 = vector.broadcast %cst_13 : f32 to vector<96x32xf32>
    %24 = arith.addf %23, %22 : vector<96x32xf32>
    %25 = arith.divf %23, %24 : vector<96x32xf32>
    %26 = arith.mulf %19, %25 : vector<96x32xf32>
    %c0_14 = arith.constant 0 : index
    %c0_15 = arith.constant 0 : index
    %c0_16 = arith.constant 0 : index
    %27 = vector.load %arg4[%c0_14, %c0_15, %c0_16] : memref<1x96x32xf32, #tpu.memory_space<vmem>>, vector<1x96x32xf32>
    %28 = vector.shape_cast %27 : vector<1x96x32xf32> to vector<96x32xf32>
    %29 = vector.shape_cast %26 : vector<96x32xf32> to vector<1x96x32xf32>
    tpu.vector_store %arg4[%c0_14, %c0_15, %c0_16], %29 {strides = array<i32>} : memref<1x96x32xf32, #tpu.memory_space<vmem>>, vector<1x96x32xf32>,
    return
  }
  func.func @transform_0(%arg0: i32) -> (i32, i32, i32) {
    %c0_i32 = arith.constant 0 : i32
    %c0_i32_0 = arith.constant 0 : i32
    %c0_i32_1 = arith.constant 0 : i32
    return %arg0, %c0_i32, %c0_i32_0 : i32, i32, i32
  }
  func.func @transform_1(%arg0: i32) -> (i32, i32, i32) {
    %c0_i32 = arith.constant 0 : i32
    %c0_i32_0 = arith.constant 0 : i32
    %c0_i32_1 = arith.constant 0 : i32
    %c0_i32_2 = arith.constant 0 : i32
    return %c0_i32, %c0_i32_0, %c0_i32_1 : i32, i32, i32
  }
  func.func @transform_2(%arg0: i32) -> (i32, i32) {
    %c0_i32 = arith.constant 0 : i32
    %c0_i32_0 = arith.constant 0 : i32
    %c0_i32_1 = arith.constant 0 : i32
    return %c0_i32, %c0_i32_0 : i32, i32
  }
  func.func @transform_3(%arg0: i32) -> (i32, i32, i32) {
    %c0_i32 = arith.constant 0 : i32
    %c0_i32_0 = arith.constant 0 : i32
    %c0_i32_1 = arith.constant 0 : i32
    return %arg0, %c0_i32, %c0_i32_0 : i32, i32, i32
  }
}

</mosaic_0001>

<bundles_post_ra>
// kernel: temporal_conv_layer.1
= control target key start
LH: loop header
LB: loop body
LE: loop exit
PB: predicated region body
PF: predicated region fallthrough
CT: control target
= control target key end

     0   :  { %s949_s12 = smov 0   ;;  %s1223_s0 = inlined_call_operand.vmem [shape: f32[2,128,3], index: 0, kind: input, shape index: {}]   ;;  %s1224_s1 = inlined_call_operand.vmem [shape: f32[3,3,64], index: 1, kind: input, shape index: {}]   ;;  %s1225_s2 = inlined_call_operand.vmem [shape: f32[1,64], index: 2, kind: input, shape index: {}]   ;;  %s1226_s3 = inlined_call_operand.vmem [shape: f32[2,96,32], index: 3, kind: output, shape index: {}]  }
   0x1 LB: > { %s794_s13 = sadd.s32 4294967295, %s926_s12   ;;  %p798_p0 = scmp.ge.s32.totalorder %s926_s12, 1  ;;  %s926_s12 = sphi %s949_s12, %s13_s12  }
   0x2   : > { %p137_p1 = scmp.lt.s32.totalorder %s926_s12, 3 }
   0x4   : > { %p138_p2 = pnand %p798_p0, %p137_p1 }
   0x5   : > { %p161_p3 = scmp.lt.s32.totalorder (!%p138_p2), %s794_s13, 1  ;;  %s928_s26 = smov (!%p138_p2), 96  }
   0x6   : > { %141 = sbr.rel (%p138_p2) target bundleno = 361 (0x169), region = 32 }
   0xb   : > { %v802_v0 = vld [vmem:[%s1224_s1 + $0x4] sm:$0x7]  ;;  %vm227_vm0 = vcmask 1042432   ;;  %v829_v1 = vld [vmem:[%s1224_s1 + $0x8] sm:$0x7]  ;;  %s1230_s13 = smov (!%p161_p3, %s794_s13), 1 }
   0xc   : > { %858 = vmatpush.msk.msra.mxu3 %vm227_vm0, %v802_v0  ;;  %830 = vmatpush.msk.msra.mxu2 %vm227_vm0, %v829_v1  ;;  %v187_v2 = vld [vmem:[%s1224_s1] sm:$0x7]  ;;  %s857_s20 = sshll.u32 %s1230_s13, 7  ;;  %vm190_vm1 = vcmask 23552   ;;  %s861_s27 = smul.u32 96, %s1230_s13 }
   0xd   : > { %803 = vmatpush.msk.msra.mxu0 %vm227_vm0, %v802_v0  ;;  %816 = vmatpush.msk.msra.mxu1 %vm227_vm0, %v187_v2  ;;  %s977_s23 = scalar_lea.vmem %s1223_s0, %s857_s20  ;;  %v1035_v22 = vld [vmem:[%s1225_s2] ss:$0 sm:$0xff] }
   0xe   : > { %859 = vmatpush.msk.msrb.mxu3 %vm227_vm0, %v187_v2  ;;  %v182_v3 = vld [vmem:[%s977_s23 + $0x58] sm:$0xff]  ;;  %v175_v4 = vld [vmem:[%s977_s23 + $0x20] sm:$0xff]  ;;  %v173_v5 = vld [vmem:[%s977_s23 + $0x10] sm:$0xff]  ;;  %s1182_s30 = scalar_lea.vmem %s1226_s3, %s861_s27 }
   0xf   : > { %813 = vmatmul.msk.f32.vlgmr.msra.gmra.mxu3 %vm190_vm1, %v182_v3  ;;  %831 = vmatmul.msk.f32.vlgmr.msra.gmra.mxu2 %vm190_vm1, %v175_v4  ;;  %v171_v6 = vld [vmem:[%s977_s23] sm:$0xff]  ;;  %v176_v8 = vld [vmem:[%s977_s23 + $0x28] sm:$0xff]  ;;  %v174_v9 = vld [vmem:[%s977_s23 + $0x18] sm:$0xff] }
  0x10   : > { %804 = vmatmul.msk.f32.vlgmr.msra.gmra.mxu0 %vm190_vm1, %v173_v5  ;;  %817 = vmatmul.msk.f32.vlgmr.msra.gmra.mxu1 %vm190_vm1, %v171_v6  ;;  %v183_v7 = vld [vmem:[%s977_s23 + $0x60] sm:$0xff]  ;;  %v172_v10 = vld [vmem:[%s977_s23 + $0x8] sm:$0xff]  ;;  %v177_v12 = vld [vmem:[%s977_s23 + $0x30] sm:$0xff] }
  0x11   : > { %860 = vmatpush.msk.msra.mxu3 %vm227_vm0, %v829_v1  ;;  %v184_v11 = vld [vmem:[%s977_s23 + $0x68] sm:$0xff]  ;;  %v178_v14 = vld [vmem:[%s977_s23 + $0x38] sm:$0xff]  ;;  %v181_v15 = vld [vmem:[%s977_s23 + $0x50] sm:$0xff] }
  0x12   : > { %v180_v13 = vld [vmem:[%s977_s23 + $0x48] sm:$0xff]  ;;  %v179_v16 = vld [vmem:[%s977_s23 + $0x40] sm:$0xff]  ;;  %v185_v17 = vld [vmem:[%s977_s23 + $0x70] sm:$0xff] }
  0x13   : > { %v186_v18 = vld [vmem:[%s977_s23 + $0x78] sm:$0xff] }
  0x17   : > { %814 = vmatmul.msk.f32.gmra.mxu3 %vm190_vm1, %v183_v7  ;;  %832 = vmatmul.msk.f32.gmra.mxu2 %vm190_vm1, %v176_v8 }
  0x18   : > { %805 = vmatmul.msk.f32.gmra.mxu0 %vm190_vm1, %v174_v9  ;;  %818 = vmatmul.msk.f32.gmra.mxu1 %vm190_vm1, %v172_v10 }
  0x1f   : > { %815 = vmatmul.msk.f32.gmra.mxu3 %vm190_vm1, %v184_v11  ;;  %833 = vmatmul.msk.f32.gmra.mxu2 %vm190_vm1, %v177_v12 }
  0x20   : > { %806 = vmatmul.msk.f32.gmra.mxu0 %vm190_vm1, %v175_v4  ;;  %819 = vmatmul.msk.f32.gmra.mxu1 %vm190_vm1, %v173_v5 }
  0x27   : > { %826 = vmatmul.msk.f32.vlgmr.msrb.gmra.mxu3 %vm190_vm1, %v180_v13  ;;  %834 = vmatmul.msk.f32.gmra.mxu2 %vm190_vm1, %v178_v14 }
  0x28   : > { %807 = vmatmul.msk.f32.gmra.mxu0 %vm190_vm1, %v176_v8  ;;  %820 = vmatmul.msk.f32.gmra.mxu1 %vm190_vm1, %v174_v9 }
  0x2f   : > { %827 = vmatmul.msk.f32.gmra.mxu3 %vm190_vm1, %v181_v15  ;;  %835 = vmatmul.msk.f32.gmra.mxu2 %vm190_vm1, %v179_v16 }
  0x30   : > { %808 = vmatmul.msk.f32.gmra.mxu0 %vm190_vm1, %v177_v12  ;;  %821 = vmatmul.msk.f32.gmra.mxu1 %vm190_vm1, %v175_v4 }
  0x37   : > { %828 = vmatmul.msk.f32.gmra.mxu3 %vm190_vm1, %v182_v3  ;;  %836 = vmatmul.msk.f32.gmra.mxu2 %vm190_vm1, %v180_v13 }
  0x38   : > { %809 = vmatmul.msk.f32.gmra.mxu0 %vm190_vm1, %v178_v14  ;;  %822 = vmatmul.msk.f32.gmra.mxu1 %vm190_vm1, %v176_v8 }
  0x3f   : > { %837 = vmatmul.msk.f32.gmra.mxu2 %vm190_vm1, %v181_v15  ;;  %840 = vmatmul.msk.f32.vlgmr.msra.gmra.mxu3 %vm190_vm1, %v184_v11 }
  0x40   : > { %810 = vmatmul.msk.f32.gmra.mxu0 %vm190_vm1, %v179_v16  ;;  %823 = vmatmul.msk.f32.gmra.mxu1 %vm190_vm1, %v177_v12 }
  0x47   : > { %838 = vmatmul.msk.f32.gmra.mxu2 %vm190_vm1, %v182_v3  ;;  %841 = vmatmul.msk.f32.gmra.mxu3 %vm190_vm1, %v185_v17 }
  0x48   : > { %811 = vmatmul.msk.f32.gmra.mxu0 %vm190_vm1, %v180_v13  ;;  %824 = vmatmul.msk.f32.gmra.mxu1 %vm190_vm1, %v178_v14 }
  0x4f   : > { %839 = vmatmul.msk.f32.gmra.mxu2 %vm190_vm1, %v183_v7  ;;  %842 = vmatmul.msk.f32.gmra.mxu3 %vm190_vm1, %v186_v18 }
  0x50   : > { %812 = vmatmul.msk.f32.gmra.mxu0 %vm190_vm1, %v181_v15  ;;  %825 = vmatmul.msk.f32.gmra.mxu1 %vm190_vm1, %v179_v16 }
  0x8d   : > { %v248_v19 = vpop.f32.mrf.mxu0  ;;  %v310_v20 = vpop.f32.mrf.mxu1 }
  0x8e   : > { %v311_v21 = vadd.f32 %v310_v20, %v248_v19 }
  0x92   : > { %v1037_v23 = vpop.f32.mrf.mxu3  ;;  %v374_v24 = vpop.f32.mrf.mxu2 }
  0x93   : > { %v410_v25 = vadd.f32 %v374_v24, %v311_v21 }
  0x95   : > { %v1040_v26 = vadd.f32 %v1035_v22, %v410_v25  ;;  %v251_v27 = vpop.f32.mrf.mxu0  ;;  %v313_v28 = vpop.f32.mrf.mxu1 }
  0x96   : > { %v314_v30 = vadd.f32 %v313_v28, %v251_v27 }
  0x97   : > { %v843_v29 = vmul.f32 -1.442695, %v1040_v26 }
  0x99   : > { %872 = vpow2.f32 %v843_v29 }
  0x9a   : > { %v1043_v31 = vpop.f32.mrf.mxu3  ;;  %v377_v32 = vpop.f32.mrf.mxu2 }
  0x9b   : > { %v411_v33 = vadd.f32 %v377_v32, %v314_v30 }
  0x9d   : > { %v1046_v34 = vadd.f32 %v1035_v22, %v411_v33  ;;  %v254_v35 = vpop.f32.mrf.mxu0  ;;  %v316_v36 = vpop.f32.mrf.mxu1 }
  0x9e   : > { %v317_v39 = vadd.f32 %v316_v36, %v254_v35 }
  0x9f   : > { %v873_v37 = vpop.eup %872  ;;  %v844_v38 = vmul.f32 -1.442695, %v1046_v34 }
  0xa0   : > { %v474_v40 = vadd.f32 1.0, %v873_v37 }
  0xa1   : > { %874 = vpow2.f32 %v844_v38 }
  0xa2   : > { %876 = vrcp.f32 %v474_v40  ;;  %v1049_v41 = vpop.f32.mrf.mxu3  ;;  %v380_v42 = vpop.f32.mrf.mxu2  ;;  %v497_v57 = vand.u32 2147483648, %v474_v40  ;;  %v495_v62 = vand.u32 2147483647, %v474_v40  ;;  %vm491_vm3 = vweird.f32 %v474_v40 }
  0xa3   : > { %v412_v43 = vadd.f32 %v380_v42, %v317_v39 }
  0xa4   : > { %v498_v5 = vor.u32 1.1754944e-38, %v497_v57  ;;  %vm496_vm5 = vcmp.eq.f32.partialorder %v495_v62, 8.507059e+37 }
  0xa5   : > { %v1052_v44 = vadd.f32 %v1035_v22, %v412_v43  ;;  %v257_v45 = vpop.f32.mrf.mxu0  ;;  %v319_v46 = vpop.f32.mrf.mxu1 }
  0xa6   : > { %v320_v49 = vadd.f32 %v319_v46, %v257_v45 }
  0xa7   : > { %v875_v47 = vpop.eup %874  ;;  %v845_v48 = vmul.f32 -1.442695, %v1052_v44 }
  0xa8   : > { %v877_v50 = vpop.eup %876  ;;  %v475_v51 = vadd.f32 1.0, %v875_v47 }
  0xa9   : > { %878 = vpow2.f32 %v845_v48  ;;  %v487_v52 = vmul.f32 %v877_v50, %v474_v40  ;;  %vm492_vm2 = vweird.f32 %v877_v50 }
  0xaa   : > { %880 = vrcp.f32 %v475_v51  ;;  %v1055_v53 = vpop.f32.mrf.mxu3  ;;  %v383_v54 = vpop.f32.mrf.mxu2  ;;  %vm493_vm4 = vmor %vm491_vm3, %vm492_vm2  ;;  %v512_v13 = vand.u32 2147483648, %v475_v51  ;;  %v510_v18 = vand.u32 2147483647, %v475_v51  ;;  %vm506_vm7 = vweird.f32 %v475_v51 }
  0xab   : > { %v413_v55 = vadd.f32 %v383_v54, %v320_v49  ;;  %v488_v56 = vsub.f32 1.0, %v487_v52 }
  0xac   : > { %v513_v28 = vor.u32 1.1754944e-38, %v512_v13  ;;  %vm511_vm9 = vcmp.eq.f32.partialorder %v510_v18, 8.507059e+37 }
  0xad   : > { %v1058_v58 = vadd.f32 %v1035_v22, %v413_v55  ;;  %v260_v59 = vpop.f32.mrf.mxu0  ;;  %v322_v60 = vpop.f32.mrf.mxu1  ;;  %v489_v61 = vmul.f32 %v877_v50, %v488_v56 }
  0xae   : > { %v323_v1 = vadd.f32 %v322_v60, %v260_v59 }
  0xaf   : > { %v879_v63 = vpop.eup %878  ;;  %v846_v0 = vmul.f32 -1.442695, %v1058_v58  ;;  %v490_v2 = vadd.f32 %v877_v50, %v489_v61 }
  0xb0   : > { %v881_v3 = vpop.eup %880  ;;  %v476_v4 = vadd.f32 1.0, %v879_v63 }
  0xb1   : > { %882 = vpow2.f32 %v846_v0  ;;  %v494_v6 = vsel %vm493_vm4, %v877_v50, %v490_v2  ;;  %v502_v7 = vmul.f32 %v881_v3, %v475_v51  ;;  %vm507_vm6 = vweird.f32 %v881_v3 }
  0xb2   : > { %884 = vrcp.f32 %v476_v4  ;;  %v1061_v8 = vpop.f32.mrf.mxu3  ;;  %v386_v9 = vpop.f32.mrf.mxu2  ;;  %v499_v10 = vsel %vm496_vm5, %v498_v5, %v494_v6  ;;  %vm508_vm8 = vmor %vm506_vm7, %vm507_vm6  ;;  %v527_v38 = vand.u32 2147483648, %v476_v4  ;;  %v525_v45 = vand.u32 2147483647, %v476_v4 }
  0xb3   : > { %v414_v11 = vadd.f32 %v386_v9, %v323_v1  ;;  %678 = vrot.lane.b32.xlu0 %v499_v10, %s928_s26  ;;  %v503_v12 = vsub.f32 1.0, %v502_v7  ;;  %vm521_vm11 = vweird.f32 %v476_v4  ;;  %v338_v51 = vadd.f32 %v1055_v53, %v1037_v23 }
  0xb4   : > { %v528_v54 = vor.u32 1.1754944e-38, %v527_v38  ;;  %vm526_vm13 = vcmp.eq.f32.partialorder %v525_v45, 8.507059e+37 }
  0xb5   : > { %v1065_v14 = vadd.f32 %v1035_v22, %v414_v11  ;;  %v263_v15 = vpop.f32.mrf.mxu0  ;;  %v325_v16 = vpop.f32.mrf.mxu1  ;;  %v504_v17 = vmul.f32 %v881_v3, %v503_v12  ;;  %v341_v12 = vadd.f32 %v1061_v8, %v1043_v31 }
  0xb6   : > { %v326_v21 = vadd.f32 %v325_v16, %v263_v15 }
  0xb7   : > { %v883_v19 = vpop.eup %882  ;;  %v847_v20 = vmul.f32 -1.442695, %v1065_v14  ;;  %v505_v24 = vadd.f32 %v881_v3, %v504_v17 }
  0xb8   : > { %v885_v25 = vpop.eup %884  ;;  %v1068_v27 = vadd.f32 1.0, %v883_v19 }
  0xb9   : > { %886 = vpow2.f32 %v847_v20  ;;  %v509_v29 = vsel %vm508_vm8, %v881_v3, %v505_v24  ;;  %v517_v30 = vmul.f32 %v885_v25, %v476_v4  ;;  %vm522_vm10 = vweird.f32 %v885_v25 }
  0xba   : > { %888 = vrcp.f32 %v1068_v27  ;;  %v1071_v32 = vpop.f32.mrf.mxu3  ;;  %v389_v33 = vpop.f32.mrf.mxu2  ;;  %v514_v35 = vsel %vm511_vm9, %v513_v28, %v509_v29  ;;  %vm523_vm12 = vmor %vm521_vm11, %vm522_vm10  ;;  %v540_v23 = vand.u32 2147483647, %v1068_v27  ;;  %v542_v53 = vand.u32 2147483648, %v1068_v27 }
  0xbb   : > { %v415_v36 = vadd.f32 %v389_v33, %v326_v21  ;;  %680 = vrot.lane.b32.xlu0 %v514_v35, %s928_s26  ;;  %v518_v37 = vsub.f32 1.0, %v517_v30  ;;  %vm536_vm15 = vweird.f32 %v1068_v27 }
  0xbc   : > { %v543_v15 = vor.u32 1.1754944e-38, %v542_v53  ;;  %vm541_vm1 = vcmp.eq.f32.partialorder %v540_v23, 8.507059e+37 }
  0xbd   : > { %v1075_v39 = vadd.f32 %v1035_v22, %v415_v36  ;;  %v266_v40 = vpop.f32.mrf.mxu0  ;;  %v328_v42 = vpop.f32.mrf.mxu1  ;;  %v519_v43 = vmul.f32 %v885_v25, %v518_v37 }
  0xbe   : > { %v329_v48 = vadd.f32 %v328_v42, %v266_v40 }
  0xbf   : > { %v887_v46 = vpop.eup %886  ;;  %v848_v47 = vmul.f32 -1.442695, %v1075_v39  ;;  %v520_v49 = vadd.f32 %v885_v25, %v519_v43  ;;  %v344_v43 = vadd.f32 %v1071_v32, %v1049_v41 }
  0xc0   : > { %v889_v50 = vpop.eup %888  ;;  %v1080_v52 = vadd.f32 1.0, %v887_v46 }
  0xc1   : > { %890 = vpow2.f32 %v848_v47  ;;  %v524_v55 = vsel %vm523_vm12, %v885_v25, %v520_v49  ;;  %v532_v56 = vmul.f32 %v889_v50, %v1068_v27  ;;  %vm537_vm14 = vweird.f32 %v889_v50 }
  0xc2   : > { %892 = vrcp.f32 %v1080_v52  ;;  %v392_v57 = vpop.f32.mrf.mxu2  ;;  %v401_v59 = vpop.f32.mrf.mxu3  ;;  %v529_v60 = vsel %vm526_vm13, %v528_v54, %v524_v55  ;;  %vm538_vm0 = vmor %vm536_vm15, %vm537_vm14  ;;  %v555_v8 = vand.u32 2147483647, %v1080_v52  ;;  %v557_v25 = vand.u32 2147483648, %v1080_v52 }
  0xc3   : > { %v416_v61 = vadd.f32 %v392_v57, %v329_v48  ;;  %v419_v62 = vadd.f32 %v401_v59, %v338_v51  ;;  %682 = vrot.lane.b32.xlu1 %v529_v60, %s928_s26  ;;  %v533_v63 = vsub.f32 1.0, %v532_v56  ;;  %vm551_vm3 = vweird.f32 %v1080_v52 }
  0xc4   : > { %v558_v46 = vor.u32 1.1754944e-38, %v557_v25  ;;  %vm556_vm5 = vcmp.eq.f32.partialorder %v555_v8, 8.507059e+37 }
  0xc5   : > { %v1088_v0 = vadd.f32 %v1035_v22, %v416_v61  ;;  %v1091_v1 = vadd.f32 %v1035_v22, %v419_v62  ;;  %v269_v2 = vpop.f32.mrf.mxu0  ;;  %v331_v3 = vpop.f32.mrf.mxu1  ;;  %v534_v4 = vmul.f32 %v889_v50, %v533_v63 }
  0xc6   : > { %v332_v9 = vadd.f32 %v331_v3, %v269_v2 }
  0xc7   : > { %v891_v5 = vpop.eup %890  ;;  %v849_v6 = vmul.f32 -1.442695, %v1088_v0  ;;  %v852_v7 = vmul.f32 -1.442695, %v1091_v1  ;;  %v535_v10 = vadd.f32 %v889_v50, %v534_v4 }
  0xc8   : > { %v893_v11 = vpop.eup %892  ;;  %v1098_v13 = vadd.f32 1.0, %v891_v5 }
  0xc9   : > { %894 = vpow2.f32 %v849_v6  ;;  %v539_v16 = vsel %vm538_vm0, %v889_v50, %v535_v10  ;;  %v547_v17 = vmul.f32 %v893_v11, %v1080_v52  ;;  %vm552_vm2 = vweird.f32 %v893_v11 }
  0xca   : > { %896 = vrcp.f32 %v1098_v13  ;;  %v395_v18 = vpop.f32.mrf.mxu2  ;;  %v404_v19 = vpop.f32.mrf.mxu3  ;;  %v544_v20 = vsel %vm541_vm1, %v543_v15, %v539_v16  ;;  %vm553_vm4 = vmor %vm551_vm3, %vm552_vm2  ;;  %v570_v56 = vand.u32 2147483647, %v1098_v13  ;;  %v572_v57 = vand.u32 2147483648, %v1098_v13 }
  0xcb   : > { %898 = vpow2.f32 %v852_v7  ;;  %v417_v21 = vadd.f32 %v395_v18, %v332_v9  ;;  %v420_v24 = vadd.f32 %v404_v19, %v341_v12  ;;  %684 = vrot.lane.b32.xlu1 %v544_v20, %s928_s26  ;;  %v548_v31 = vsub.f32 1.0, %v547_v17 }
  0xcc   : > { %vm566_vm7 = vweird.f32 %v1098_v13  ;;  %v573_v4 = vor.u32 1.1754944e-38, %v572_v57  ;;  %vm571_vm9 = vcmp.eq.f32.partialorder %v570_v56, 8.507059e+37 }
  0xcd   : > { %v1106_v27 = vadd.f32 %v1035_v22, %v417_v21  ;;  %v1109_v28 = vadd.f32 %v1035_v22, %v420_v24  ;;  %v272_v29 = vpop.f32.mrf.mxu0  ;;  %v334_v30 = vpop.f32.mrf.mxu1  ;;  %v549_v33 = vmul.f32 %v893_v11, %v548_v31 }
  0xce   : > { %v335_v38 = vadd.f32 %v334_v30, %v272_v29 }
  0xcf   : > { %v895_v35 = vpop.eup %894  ;;  %v850_v36 = vmul.f32 -1.442695, %v1106_v27  ;;  %v853_v37 = vmul.f32 -1.442695, %v1109_v28  ;;  %v550_v40 = vadd.f32 %v893_v11, %v549_v33 }
  0xd0   : > { %v897_v42 = vpop.eup %896  ;;  %v1116_v45 = vadd.f32 1.0, %v895_v35 }
  0xd1   : > { %v899_v47 = vpop.eup %898  ;;  %900 = vpow2.f32 %v850_v36  ;;  %v554_v48 = vsel %vm553_vm4, %v893_v11, %v550_v40  ;;  %v562_v49 = vmul.f32 %v897_v42, %v1098_v13  ;;  %vm567_vm6 = vweird.f32 %v897_v42 }
  0xd2   : > { %902 = vrcp.f32 %v1116_v45  ;;  %v1120_v50 = vadd.f32 1.0, %v899_v47  ;;  %v398_v51 = vpop.f32.mrf.mxu2  ;;  %v407_v52 = vpop.f32.mrf.mxu3  ;;  %v559_v54 = vsel %vm556_vm5, %v558_v46, %v554_v48  ;;  %vm568_vm8 = vmor %vm566_vm7, %vm567_vm6  ;;  %v587_v12 = vand.u32 2147483648, %v1116_v45 }
  0xd3   : > { %904 = vpow2.f32 %v853_v37  ;;  %v418_v55 = vadd.f32 %v398_v51, %v335_v38  ;;  %v421_v41 = vadd.f32 %v407_v52, %v344_v43  ;;  %686 = vrot.lane.b32.xlu2 %v559_v54, %s928_s26  ;;  %v563_v32 = vsub.f32 1.0, %v562_v49 }
  0xd4   : > { %906 = vrcp.f32 %v1120_v50  ;;  %v585_v16 = vand.u32 2147483647, %v1116_v45  ;;  %vm581_vm11 = vweird.f32 %v1116_v45  ;;  %v588_v24 = vor.u32 1.1754944e-38, %v587_v12 }
  0xd5   : > { %v1127_v59 = vadd.f32 %v1035_v22, %v418_v55  ;;  %v1130_v60 = vadd.f32 %v1035_v22, %v421_v41  ;;  %v564_v61 = vmul.f32 %v897_v42, %v563_v32  ;;  %v630_v36 = vand.u32 2147483647, %v1120_v50 }
  0xd6   : > { %vm586_vm13 = vcmp.eq.f32.partialorder %v585_v16, 8.507059e+37  ;;  %v632_v40 = vand.u32 2147483648, %v1120_v50  ;;  %vm626_vm0 = vweird.f32 %v1120_v50 }
  0xd7   : > { %v901_v62 = vpop.eup %900  ;;  %v851_v63 = vmul.f32 -1.442695, %v1127_v59  ;;  %v854_v23 = vmul.f32 -1.442695, %v1130_v60  ;;  %v565_v53 = vadd.f32 %v897_v42, %v564_v61  ;;  %vm631_vm3 = vcmp.eq.f32.partialorder %v630_v36, 8.507059e+37 }
  0xd8   : > { %v903_v2 = vpop.eup %902  ;;  %v481_v3 = vadd.f32 1.0, %v901_v62  ;;  %v633_v55 = vor.u32 1.1754944e-38, %v632_v40 }
  0xd9   : > { %v905_v5 = vpop.eup %904  ;;  %908 = vpow2.f32 %v851_v63  ;;  %v569_v6 = vsel %vm568_vm8, %v897_v42, %v565_v53  ;;  %v577_v22 = vmul.f32 %v903_v2, %v1116_v45  ;;  %vm582_vm10 = vweird.f32 %v903_v2 }
  0xda   : > { %v1136_v7 = vpop.eup %906  ;;  %910 = vrcp.f32 %v481_v3  ;;  %v1138_v9 = vadd.f32 1.0, %v905_v5  ;;  %v574_v10 = vsel %vm571_vm9, %v573_v4, %v569_v6  ;;  %vm583_vm12 = vmor %vm581_vm11, %vm582_vm10  ;;  %v600_v42 = vand.u32 2147483647, %v481_v3 }
  0xdb   : > { %912 = vpow2.f32 %v854_v23  ;;  %688 = vrot.lane.b32.xlu2 %v574_v10, %s928_s26  ;;  %v578_v11 = vsub.f32 1.0, %v577_v22  ;;  %v622_v13 = vmul.f32 %v1136_v7, %v1120_v50  ;;  %vm627_vm14 = vweird.f32 %v1136_v7 }
  0xdc   : > { %914 = vrcp.f32 %v1138_v9  ;;  %v602_v43 = vand.u32 2147483648, %v481_v3  ;;  %vm1158_vm1 = vmor %vm626_vm0, %vm627_vm14  ;;  %vm596_vm2 = vweird.f32 %v481_v3  ;;  %vm601_vm5 = vcmp.eq.f32.partialorder %v600_v42, 8.507059e+37 }
  0xdd   : > { %v579_v15 = vmul.f32 %v903_v2, %v578_v11  ;;  %v623_v17 = vsub.f32 1.0, %v622_v13  ;;  %vm641_vm9 = vweird.f32 %v1138_v9  ;;  %v645_v5 = vand.u32 2147483647, %v1138_v9 }
  0xde   : > { %v603_v54 = vor.u32 1.1754944e-38, %v602_v43 }
  0xdf   : > { %v909_v18 = vpop.eup %908  ;;  %v580_v19 = vadd.f32 %v903_v2, %v579_v15  ;;  %v624_v31 = vmul.f32 %v1136_v7, %v623_v17 }
  0xe0   : > { %v911_v20 = vpop.eup %910  ;;  %v482_v21 = vadd.f32 1.0, %v909_v18 }
  0xe1   : > { %v913_v8 = vpop.eup %912  ;;  %v584_v25 = vsel %vm583_vm12, %v903_v2, %v580_v19  ;;  %v592_v29 = vmul.f32 %v911_v20, %v481_v3  ;;  %v625_v38 = vadd.f32 %v1136_v7, %v624_v31  ;;  %vm597_vm15 = vweird.f32 %v911_v20 }
  0xe2   : > { %v915_v30 = vpop.eup %914  ;;  %916 = vrcp.f32 %v482_v21  ;;  %v1148_v33 = vadd.f32 1.0, %v913_v8  ;;  %v589_v35 = vsel %vm586_vm13, %v588_v24, %v584_v25  ;;  %vm598_vm4 = vmor %vm596_vm2, %vm597_vm15  ;;  %vm611_vm6 = vweird.f32 %v482_v21 }
  0xe3   : > { %690 = vrot.lane.b32.xlu0 %v589_v35, %s928_s26  ;;  %v593_v37 = vsub.f32 1.0, %v592_v29  ;;  %v637_v45 = vmul.f32 %v915_v30, %v1138_v9  ;;  %v629_v51 = vsel %vm1158_vm1, %v1136_v7, %v625_v38  ;;  %v615_v56 = vand.u32 2147483647, %v482_v21 }
  0xe4   : > { %918 = vrcp.f32 %v1148_v33  ;;  %v634_v62 = vsel %vm631_vm3, %v633_v55, %v629_v51  ;;  %v617_v63 = vand.u32 2147483648, %v482_v21  ;;  %vm642_vm7 = vweird.f32 %v915_v30 }
  0xe5   : > { %v594_v46 = vmul.f32 %v911_v20, %v593_v37  ;;  %v638_v48 = vsub.f32 1.0, %v637_v45  ;;  %v647_v3 = vand.u32 2147483648, %v1138_v9  ;;  %vm643_vm10 = vmor %vm641_vm9, %vm642_vm7  ;;  %vm616_vm12 = vcmp.eq.f32.partialorder %v615_v56, 8.507059e+37 }
  0xe6   : > { %v618_v22 = vor.u32 1.1754944e-38, %v617_v63  ;;  %vm646_vm13 = vcmp.eq.f32.partialorder %v645_v5, 8.507059e+37  ;;  %v662_v9 = vand.u32 2147483648, %v1148_v33  ;;  %vm656_vm15 = vweird.f32 %v1148_v33 }
  0xe7   : > { %v595_v49 = vadd.f32 %v911_v20, %v594_v46  ;;  %v639_v41 = vmul.f32 %v915_v30, %v638_v48  ;;  %v648_v12 = vor.u32 1.1754944e-38, %v647_v3  ;;  %v660_v18 = vand.u32 2147483647, %v1148_v33 }
  0xe8   : > { %v917_v52 = vpop.eup %916  ;;  %vm726_vm2 = vcmask 261120  }
  0xe9   : > { %v599_v32 = vsel %vm598_vm4, %v911_v20, %v595_v49  ;;  %v607_v50 = vmul.f32 %v917_v52, %v482_v21  ;;  %vm612_vm8 = vweird.f32 %v917_v52  ;;  %v640_v53 = vadd.f32 %v915_v30, %v639_v41 }
  0xea   : > { %v919_v57 = vpop.eup %918  ;;  %v604_v61 = vsel %vm601_vm5, %v603_v54, %v599_v32  ;;  %vm613_vm11 = vmor %vm611_vm6, %vm612_vm8  ;;  %v663_v20 = vor.u32 1.1754944e-38, %v662_v9  ;;  %vm661_vm1 = vcmp.eq.f32.partialorder %v660_v18, 8.507059e+37 }
  0xeb   : > { %692 = vrot.lane.b32.xlu1 %v604_v61, %s928_s26  ;;  %696 = vrot.lane.b32.xlu0 %v634_v62, %s928_s26  ;;  %v608_v23 = vsub.f32 1.0, %v607_v50  ;;  %v652_v2 = vmul.f32 %v919_v57, %v1148_v33  ;;  %v644_v10 = vsel %vm643_vm10, %v915_v30, %v640_v53  ;;  %vm657_vm14 = vweird.f32 %v919_v57 }
  0xec   : > { %v649_v16 = vsel %vm646_vm13, %v648_v12, %v644_v10  ;;  %vm658_vm0 = vmor %vm656_vm15, %vm657_vm14 }
  0xed   : > { %v609_v4 = vmul.f32 %v917_v52, %v608_v23  ;;  %v653_v6 = vsub.f32 1.0, %v652_v2 }
  0xef   : > { %v610_v7 = vadd.f32 %v917_v52, %v609_v4  ;;  %v654_v11 = vmul.f32 %v919_v57, %v653_v6 }
  0xf1   : > { %v614_v13 = vsel %vm613_vm11, %v917_v52, %v610_v7  ;;  %v655_v17 = vadd.f32 %v919_v57, %v654_v11 }
  0xf2   : > { %v619_v15 = vsel %vm616_vm12, %v618_v22, %v614_v13 }
  0xf3   : > { %694 = vrot.lane.b32.xlu2 %v619_v15, %s928_s26  ;;  %698 = vrot.lane.b32.xlu1 %v649_v16, %s928_s26  ;;  %v659_v19 = vsel %vm658_vm0, %v919_v57, %v655_v17 }
  0xf4   : > { %v664_v21 = vsel %vm661_vm1, %v663_v20, %v659_v19 }
  0xfb   : > { %700 = vrot.lane.b32.xlu2 %v664_v21, %s928_s26 }
 0x125   : > { %v679_v24 = vpop.permute.xlu0 %678 }
 0x126   : > { %v714_v31 = vmul.f32 %v679_v24, %v1040_v26 }
 0x128   : > { %727 = vst.msk [vmem:[%s1182_s30] sm:$0xff] %vm726_vm2, %v714_v31 }
 0x12d   : > { %v687_v8 = vpop.permute.xlu2 %686  ;;  %v681_v25 = vpop.permute.xlu0 %680 }
 0x12e   : > { %v718_v29 = vmul.f32 %v687_v8, %v1065_v14  ;;  %v715_v30 = vmul.f32 %v681_v25, %v1046_v34 }
 0x130   : > { %731 = vst.msk [vmem:[%s1182_s30 + $0x20] sm:$0xff] %vm726_vm2, %v718_v29 }
 0x131   : > { %728 = vst.msk [vmem:[%s1182_s30 + $0x8] sm:$0xff] %vm726_vm2, %v715_v30 }
 0x135   : > { %v689_v33 = vpop.permute.xlu2 %688  ;;  %v683_v35 = vpop.permute.xlu1 %682 }
 0x136   : > { %v719_v26 = vmul.f32 %v689_v33, %v1075_v39  ;;  %v716_v36 = vmul.f32 %v683_v35, %v1052_v44 }
 0x138   : > { %732 = vst.msk [vmem:[%s1182_s30 + $0x28] sm:$0xff] %vm726_vm2, %v719_v26 }
 0x139   : > { %729 = vst.msk [vmem:[%s1182_s30 + $0x10] sm:$0xff] %vm726_vm2, %v716_v36 }
 0x13d   : > { %v685_v37 = vpop.permute.xlu1 %684 }
 0x13e   : > { %v717_v34 = vmul.f32 %v685_v37, %v1058_v58 }
 0x140   : > { %730 = vst.msk [vmem:[%s1182_s30 + $0x18] sm:$0xff] %vm726_vm2, %v717_v34 }
 0x14d   : > { %v695_v14 = vpop.permute.xlu2 %694 }
 0x14e   : > { %v722_v38 = vmul.f32 %v695_v14, %v1127_v59 }
 0x150   : > { %735 = vst.msk [vmem:[%s1182_s30 + $0x40] sm:$0xff] %vm726_vm2, %v722_v38 }
 0x155   : > { %v701_v39 = vpop.permute.xlu2 %700  ;;  %v691_v40 = vpop.permute.xlu0 %690 }
 0x156   : > { %v725_v44 = vmul.f32 %v701_v39, %v1130_v60  ;;  %v720_v42 = vmul.f32 %v691_v40, %v1088_v0 }
 0x158   : > { %738 = vst.msk [vmem:[%s1182_s30 + $0x58] sm:$0xff] %vm726_vm2, %v725_v44 }
 0x159   : > { %733 = vst.msk [vmem:[%s1182_s30 + $0x30] sm:$0xff] %vm726_vm2, %v720_v42 }
 0x15d   : > { %v693_v58 = vpop.permute.xlu1 %692  ;;  %v697_v43 = vpop.permute.xlu0 %696 }
 0x15e   : > { %v721_v45 = vmul.f32 %v693_v58, %v1106_v27  ;;  %v723_v46 = vmul.f32 %v697_v43, %v1091_v1 }
 0x160   : > { %734 = vst.msk [vmem:[%s1182_s30 + $0x38] sm:$0xff] %vm726_vm2, %v721_v45 }
 0x161   : > { %736 = vst.msk [vmem:[%s1182_s30 + $0x48] sm:$0xff] %vm726_vm2, %v723_v46 }
 0x165   : > { %v699_v59 = vpop.permute.xlu1 %698 }
 0x166   : > { %v724_v47 = vmul.f32 %v699_v59, %v1109_v28 }
 0x168   : > { %737 = vst.msk [vmem:[%s1182_s30 + $0x50] sm:$0xff] %vm726_vm2, %v724_v47 }
 0x169 PF: > { %s13_s12 = sadd.s32 1, %s926_s12  }
 0x16a   : > { %p10_p4 = scmp.ge.s32.totalorder %s13_s12, 4  }
 0x16c   :  { %12 = sbr.rel (!%p10_p4) target bundleno = 1 (0x1), region = 64 }

</bundles_post_ra>
